<compile_context>
chip_gen: v7x
topology: tpu7x:2x2x1
jax: 0.10.0
libtpu: 0.0.40
codegen_flags: <defaults>
</compile_context>

<pallas_src>
import jax
import jax.numpy as jnp
from jax.experimental import pallas as pl
from jax.experimental.pallas import tpu as pltpu


# --------------------------- packed-parameter layout ------------------------

def _vec_layout(Ht, Hx, hidden_cat, HE, C, L):
    """Row layout of the slab holding every 1-row parameter (one per sublane)."""
    entries = [('t_w1', Ht), ('t_b1', Ht), ('t_b2', Ht), ('x_b1', Hx), ('x_b2', Hx)]
    for li in range(L):
        entries += [(f'b{li}', Hx), (f'gamma{li}', Hx), (f'beta{li}', Hx)]
    entries += [('o_b1', hidden_cat), ('o_b2', HE), ('e_b1', HE), ('e_b2', C)]
    layout = {name: (row, width) for row, (name, width) in enumerate(entries)}
    return layout, len(entries), max(w for _, w in entries)


# --------------------------------- kernel -----------------------------------

def _make_kernel(*, N, in_X, Ht, Hx, HE, C, B, L, vec_layout):
    f32, bf16 = jnp.float32, jnp.bfloat16
    hidden_cat = (L + 1) * Hx + Ht

    def kernel(t_ref, idx_ref, x_ref, a_ref, vecs_ref, inw_ref, lw_ref,
               ow_ref, ew_ref, o_ref, h_scratch):
        def vec(name):                                   # static slice -> (1, w) f32
            r, w = vec_layout[name]
            return vecs_ref[r:r + 1, :w]

        # ---- GNNTower.mlp_in_t: Linear(1,Ht)->ReLU->Linear(Ht,Ht)->ReLU ----
        # First Linear has in_features=1 -> scalar * row on the VPU.
        h_t = jnp.maximum(t_ref[0] * vec('t_w1') + vec('t_b1'), 0.0)         # (1, Ht)
        t_w2 = inw_ref[0:Ht, 0:Ht].astype(bf16)
        h_t = jnp.maximum(
            jnp.dot(h_t.astype(bf16), t_w2, preferred_element_type=f32) + vec('t_b2'),
            0.0)
        h_t_bf = h_t.astype(bf16)

        # ---- GNNTower.mlp_in_X: Linear(in_X,Hx)->ReLU->Linear(Hx,Hx)->ReLU ----
        x_w1 = inw_ref[Ht:Ht + in_X, 0:Hx].astype(bf16)
        x_w2 = inw_ref[Ht + in_X:Ht + in_X + Hx, 0:Hx].astype(bf16)
        h = jnp.maximum(
            jnp.dot(x_ref[...], x_w1, preferred_element_type=f32) + vec('x_b1'), 0.0)
        h = jnp.maximum(
            jnp.dot(h.astype(bf16), x_w2, preferred_element_type=f32) + vec('x_b2'), 0.0)

        a = a_ref[...]                                   # (N, N) bf16, pre-blended A or I

        # mlp_out first Linear accumulated block-by-block (concat never built).
        acc = jnp.dot(h.astype(bf16),
                      ow_ref[0:Hx, 0:hidden_cat].astype(bf16),
                      preferred_element_type=f32)

        # ---- GNN layers (unrolled; L is a Python constant) ----
        for li in range(L):
            lw = lw_ref[li]                              # (Hx+Ht, Hx) f32
            w_x = lw[0:Hx, :].astype(bf16)
            w_t = lw[Hx:Hx + Ht, :].astype(bf16)
            aggr = jnp.dot(a, h.astype(bf16), preferred_element_type=f32)    # A_eff @ h
            # concat([aggr, h_t_expand]) @ W  ==  aggr @ W_x + h_t @ W_t
            z = (jnp.dot(aggr.astype(bf16), w_x, preferred_element_type=f32)
                 + jnp.dot(h_t_bf, w_t, preferred_element_type=f32)          # (1,Hx) bcast
                 + vec(f'b{li}'))
            zr = jnp.maximum(z, 0.0)                                         # ReLU
            mean = jnp.mean(zr, axis=-1, keepdims=True)                      # LayerNorm
            cen = zr - mean
            var = jnp.mean(cen * cen, axis=-1, keepdims=True)
            inv = jax.lax.rsqrt(var + 1e-5)                                  # EUP slot
            h = cen * (inv * vec(f'gamma{li}')) + vec(f'beta{li}')
            # Dropout: identity in eval mode.
            acc = acc + jnp.dot(
                h.astype(bf16),
                ow_ref[(li + 1) * Hx:(li + 2) * Hx, 0:hidden_cat].astype(bf16),
                preferred_element_type=f32)

        # ---- GNNTower.mlp_out: (+ h_t block, row-broadcast) -> ReLU -> Linear ----
        acc = acc + jnp.dot(h_t_bf,
                            ow_ref[(L + 1) * Hx:hidden_cat, 0:hidden_cat].astype(bf16),
                            preferred_element_type=f32) + vec('o_b1')
        h1 = jnp.maximum(acc, 0.0)
        o_w2 = ow_ref[:, hidden_cat:hidden_cat + HE].astype(bf16)
        h_enc = jnp.dot(h1.astype(bf16), o_w2, preferred_element_type=f32) + vec('o_b2')

        # ---- LinkPredictor: h[src] * h[dst] via dynamic sublane reads (no MXU) ----
        h_scratch[...] = h_enc                           # (N, HE) f32 in VMEM
        rows = []
        for i in range(B):                               # B is a small static constant
            hs = h_scratch[pl.ds(idx_ref[i], 1), :]
            hd = h_scratch[pl.ds(idx_ref[B + i], 1), :]
            rows.append(hs * hd)
        e = jnp.concatenate(rows, axis=0)                # (B, HE)

        e_w1 = ew_ref[:, 0:HE].astype(bf16)
        e_w2 = ew_ref[:, HE:HE + C].astype(bf16)
        eh = jnp.maximum(
            jnp.dot(e.astype(bf16), e_w1, preferred_element_type=f32) + vec('e_b1'), 0.0)
        o_ref[...] = (jnp.dot(eh.astype(bf16), e_w2, preferred_element_type=f32)
                      + vec('e_b2'))

    return kernel


# ------------------------- parameters (packed slabs) ------------------------

def init_params(key, in_X, num_classes_E, hidden_t, hidden_X, hidden_E, num_gnn_layers):
    L = num_gnn_layers
    hidden_cat = (L + 1) * hidden_X + hidden_t
    keys = jax.random.split(key, 8 + L)
    ki = iter(keys)

    def lin(k, din, dout):
        # Mirrors nn.Linear default init: U(-1/sqrt(fan_in), +1/sqrt(fan_in)).
        kw, kb = jax.random.split(k)
        bound = 1.0 / (din ** 0.5)
        w = jax.random.uniform(kw, (din, dout), jnp.float32, -bound, bound)
        b = jax.random.uniform(kb, (dout,), jnp.float32, -bound, bound)
        return w, b

    t_w1, t_b1 = lin(next(ki), 1, hidden_t)
    t_w2, t_b2 = lin(next(ki), hidden_t, hidden_t)
    x_w1, x_b1 = lin(next(ki), in_X, hidden_X)
    x_w2, x_b2 = lin(next(ki), hidden_X, hidden_X)
    layer_ws, layer_raw, layer_vecs = [], [], []
    for li in range(L):
        w, b = lin(next(ki), hidden_X + hidden_t, hidden_X)
        gamma = jnp.ones((hidden_X,), jnp.float32)
        beta = jnp.zeros((hidden_X,), jnp.float32)
        layer_ws.append(w)
        layer_raw.append({'w': w, 'b': b, 'gamma': gamma, 'beta': beta})
        layer_vecs += [(f'b{li}', b), (f'gamma{li}', gamma), (f'beta{li}', beta)]
    o_w1, o_b1 = lin(next(ki), hidden_cat, hidden_cat)
    o_w2, o_b2 = lin(next(ki), hidden_cat, hidden_E)
    e_w1, e_b1 = lin(next(ki), hidden_E, hidden_E)
    e_w2, e_b2 = lin(next(ki), hidden_E, num_classes_E)

    # --- pack every 1-row parameter into one (rows, width) f32 slab ---
    vec_layout, n_rows, vec_width = _vec_layout(hidden_t, hidden_X, hidden_cat,
                                                hidden_E, num_classes_E, L)
    named = dict([('t_w1', t_w1[0]), ('t_b1', t_b1), ('t_b2', t_b2),
                  ('x_b1', x_b1), ('x_b2', x_b2)] + layer_vecs +
                 [('o_b1', o_b1), ('o_b2', o_b2), ('e_b1', e_b1), ('e_b2', e_b2)])
    vecs = jnp.zeros((n_rows, vec_width), jnp.float32)
    for name, (row, width) in vec_layout.items():
        vecs = vecs.at[row, :width].set(named[name])

    # --- small input weights stacked on rows, columns padded to a common width ---
    in_w_width = max(hidden_t, hidden_X)

    def pad_cols(w):
        return jnp.pad(w, ((0, 0), (0, in_w_width - w.shape[1])))

    in_w = jnp.concatenate([pad_cols(t_w2), pad_cols(x_w1), pad_cols(x_w2)], axis=0)
    layer_w = jnp.stack(layer_ws, axis=0)                     # (L, Hx+Ht, Hx)
    o_w = jnp.concatenate([o_w1, o_w2], axis=1)               # (hidden_cat, hidden_cat+HE)
    e_w = jnp.concatenate([e_w1, e_w2], axis=1)               # (HE, HE+C)

    raw = {'t_w1': t_w1, 't_b1': t_b1, 't_w2': t_w2, 't_b2': t_b2,
           'x_w1': x_w1, 'x_b1': x_b1, 'x_w2': x_w2, 'x_b2': x_b2,
           'layers': layer_raw,
           'o_w1': o_w1, 'o_b1': o_b1, 'o_w2': o_w2, 'o_b2': o_b2,
           'e_w1': e_w1, 'e_b1': e_b1, 'e_w2': e_w2, 'e_b2': e_b2}
    dims = dict(in_X=in_X, Ht=hidden_t, Hx=hidden_X, HE=hidden_E,
                C=num_classes_E, L=L)
    return {'vecs': vecs, 'in_w': in_w, 'layer_w': layer_w, 'o_w': o_w, 'e_w': e_w,
            'dims': dims, 'raw': raw}


# --------------------------------- forward ----------------------------------

def gnn_asymm_forward(params, t_float_E, X_one_hot_2d, A_t, batch_src, batch_dst):
    d = params['dims']
    in_X, Ht, Hx, HE, C, L = d['in_X'], d['Ht'], d['Hx'], d['HE'], d['C'], d['L']
    N = X_one_hot_2d.shape[0]
    B = batch_src.shape[0]
    hidden_cat = (L + 1) * Hx + Ht
    vec_layout, _, _ = _vec_layout(Ht, Hx, hidden_cat, HE, C, L)

    t = jnp.asarray(t_float_E, jnp.float32).reshape(1)                 # SMEM scalar
    idx = jnp.concatenate([batch_src.astype(jnp.int32).reshape(-1),
                           batch_dst.astype(jnp.int32).reshape(-1)])   # (2B,) SMEM
    X = X_one_hot_2d.astype(jnp.bfloat16)                              # 0/1: exact in bf16

    # torch sparse fast-path (A.nnz == 0 -> aggregation is identity) pre-blended
    # here, so the kernel always runs a single A_eff @ h matmul per layer.
    has_edges = jnp.any(A_t != 0)
    A_eff = jnp.where(has_edges, A_t.astype(jnp.float32),
                      jnp.eye(N, dtype=jnp.float32)).astype(jnp.bfloat16)

    kernel = _make_kernel(N=N, in_X=in_X, Ht=Ht, Hx=Hx, HE=HE, C=C, B=B, L=L,
                          vec_layout=vec_layout)
    vmem = pltpu.MemorySpace.VMEM
    smem = pltpu.MemorySpace.SMEM

    # TODO(synk): for large N, tile the A_eff @ h aggregation over a (row, k) grid
    # with an f32 VMEM accumulator; size tiles for v7x's 64 MiB VMEM (~half a v6e
    # tile), prefer 256-multiple contraction dims on v7x, mark the row axis
    # "parallel" to shard across its 2 TensorCores, and present a lane-dense
    # (multiple-of-128 last dim) output once B/C grow.
    return pl.pallas_call(
        kernel,
        out_shape=jax.ShapeDtypeStruct((B, C), jnp.float32),
        in_specs=[pl.BlockSpec(memory_space=smem),     # t
                  pl.BlockSpec(memory_space=smem),     # src/dst indices
                  pl.BlockSpec(memory_space=vmem),     # X one-hot
                  pl.BlockSpec(memory_space=vmem),     # A_eff
                  pl.BlockSpec(memory_space=vmem),     # vecs slab
                  pl.BlockSpec(memory_space=vmem),     # in_w slab
                  pl.BlockSpec(memory_space=vmem),     # layer_w slab
                  pl.BlockSpec(memory_space=vmem),     # o_w slab
                  pl.BlockSpec(memory_space=vmem)],    # e_w slab
        out_specs=pl.BlockSpec(memory_space=vmem),
        scratch_shapes=[pltpu.VMEM((N, HE), jnp.float32)],
    )(t, idx, X, A_eff, params['vecs'], params['in_w'], params['layer_w'],
      params['o_w'], params['e_w'])


# --------------------- pure-JAX reference (same bf16 casts) ------------------

def gnn_asymm_reference(raw, t_float_E, X, A, src, dst):
    f32, bf16 = jnp.float32, jnp.bfloat16
    mm = lambda a, b: jnp.dot(a.astype(bf16), b.astype(bf16), preferred_element_type=f32)
    N = X.shape[0]
    t = jnp.asarray(t_float_E, f32).reshape(1, 1)
    h_t = jnp.maximum(t * raw['t_w1'] + raw['t_b1'], 0.0)
    h_t = jnp.maximum(mm(h_t, raw['t_w2']) + raw['t_b2'], 0.0)
    h = jnp.maximum(mm(X, raw['x_w1']) + raw['x_b1'], 0.0)
    h = jnp.maximum(mm(h, raw['x_w2']) + raw['x_b2'], 0.0)
    has_edges = jnp.any(A != 0)
    A_eff = jnp.where(has_edges, A.astype(f32), jnp.eye(N, dtype=f32))
    h_list = [h]
    for lp in raw['layers']:
        aggr = mm(A_eff, h)
        z = jnp.concatenate([aggr, jnp.broadcast_to(h_t, (N, h_t.shape[1]))], axis=1)
        zr = jnp.maximum(mm(z, lp['w']) + lp['b'], 0.0)
        mean = jnp.mean(zr, axis=-1, keepdims=True)
        cen = zr - mean
        var = jnp.mean(cen * cen, axis=-1, keepdims=True)
        h = cen * jax.lax.rsqrt(var + 1e-5) * lp['gamma'] + lp['beta']
        h_list.append(h)
    h_cat = jnp.concatenate(h_list + [jnp.broadcast_to(h_t, (N, h_t.shape[1]))], axis=1)
    h1 = jnp.maximum(mm(h_cat, raw['o_w1']) + raw['o_b1'], 0.0)
    h_enc = mm(h1, raw['o_w2']) + raw['o_b2']
    e = h_enc[src] * h_enc[dst]
    eh = jnp.maximum(mm(e, raw['e_w1']) + raw['e_b1'], 0.0)
    return mm(eh, raw['e_w2']) + raw['e_b2']


if __name__ == "__main__":
    N, in_X, num_classes_E = 16, 4, 3
    hidden_t, hidden_X, hidden_E, num_gnn_layers = 8, 16, 16, 2
    B = 8

    key = jax.random.PRNGKey(0)
    k_p, k_x, k_a, k_s, k_d = jax.random.split(key, 5)

    params = init_params(k_p, in_X, num_classes_E,
                         hidden_t, hidden_X, hidden_E, num_gnn_layers)

    labels = jax.random.randint(k_x, (N,), 0, in_X)
    X_one_hot_2d = jax.nn.one_hot(labels, in_X, dtype=jnp.float32)      # [N, in_X]
    A_t = (jax.random.uniform(k_a, (N, N)) < 0.25).astype(jnp.float32)
    A_t = A_t * (1.0 - jnp.eye(N, dtype=jnp.float32))                   # [N, N] dense adj
    t_float_E = jnp.array([0.5], jnp.float32)                           # [1]
    batch_src = jax.random.randint(k_s, (B,), 0, N)
    batch_dst = jax.random.randint(k_d, (B,), 0, N)

    logit_E = gnn_asymm_forward(params, t_float_E, X_one_hot_2d, A_t,
                                batch_src, batch_dst)
    jax.block_until_ready(logit_E)
    assert logit_E.shape == (B, num_classes_E)

    ref = gnn_asymm_reference(params['raw'], t_float_E, X_one_hot_2d, A_t,
                              batch_src, batch_dst)
    assert bool(jnp.allclose(logit_E, ref, rtol=1e-2, atol=1e-2)), "mismatch vs reference"
    print("KERNEL_OK")
</pallas_src>

<mosaic_0001>
module attributes {stable_mosaic.version = 11 : i64} {
  func.func @kernel(%arg0: memref<1xf32, #tpu.memory_space<smem>>, %arg1: memref<16xi32, #tpu.memory_space<smem>>, %arg2: memref<16x4xbf16, #tpu.memory_space<vmem>>, %arg3: memref<16x16xbf16, #tpu.memory_space<vmem>>, %arg4: memref<15x56xf32, #tpu.memory_space<vmem>>, %arg5: memref<28x16xf32, #tpu.memory_space<vmem>>, %arg6: memref<2x24x16xf32, #tpu.memory_space<vmem>>, %arg7: memref<56x72xf32, #tpu.memory_space<vmem>>, %arg8: memref<16x19xf32, #tpu.memory_space<vmem>>, %arg9: memref<8x3xf32, #tpu.memory_space<vmem>>, %arg10: memref<16x16xf32, #tpu.memory_space<vmem>>) attributes {dimension_semantics = [], scalar_prefetch = 0 : i64, scratch_operands = 1 : i64, tpu.core_type = #tpu.core_type<tc>} {
    %c0 = arith.constant 0 : index
    %0 = memref.load %arg0[%c0] : memref<1xf32, #tpu.memory_space<smem>>
    %c0_0 = arith.constant 0 : index
    %c0_1 = arith.constant 0 : index
    %1 = vector.load %arg4[%c0_0, %c0_1] : memref<15x56xf32, #tpu.memory_space<vmem>>, vector<1x8xf32>
    %2 = vector.broadcast %0 : f32 to vector<1x8xf32>
    %3 = arith.mulf %2, %1 : vector<1x8xf32>
    %c1 = arith.constant 1 : index
    %c0_2 = arith.constant 0 : index
    %4 = vector.load %arg4[%c1, %c0_2] : memref<15x56xf32, #tpu.memory_space<vmem>>, vector<1x8xf32>
    %5 = arith.addf %3, %4 : vector<1x8xf32>
    %cst = arith.constant 0.000000e+00 : f32
    %6 = vector.broadcast %cst : f32 to vector<1x8xf32>
    %7 = arith.maximumf %5, %6 : vector<1x8xf32>
    %c0_3 = arith.constant 0 : index
    %c0_4 = arith.constant 0 : index
    %8 = vector.load %arg5[%c0_3, %c0_4] : memref<28x16xf32, #tpu.memory_space<vmem>>, vector<8x8xf32>
    %9 = arith.truncf %8 : vector<8x8xf32> to vector<8x8xbf16>
    %10 = arith.truncf %7 : vector<1x8xf32> to vector<1x8xbf16>
    %cst_5 = arith.constant dense<0.000000e+00> : vector<1x8xf32>
    %11 = tpu.matmul %10, %9, %cst_5 {dimension_numbers = #tpu.dot_dimension_numbers<[1], [0], [0], [1], [0, 0, 1, 1], [], []>} : vector<1x8xbf16>, vector<8x8xbf16>, vector<1x8xf32> -> vector<1x8xf32>
    %c2 = arith.constant 2 : index
    %c0_6 = arith.constant 0 : index
    %12 = vector.load %arg4[%c2, %c0_6] : memref<15x56xf32, #tpu.memory_space<vmem>>, vector<1x8xf32>
    %13 = arith.addf %11, %12 : vector<1x8xf32>
    %cst_7 = arith.constant 0.000000e+00 : f32
    %14 = vector.broadcast %cst_7 : f32 to vector<1x8xf32>
    %15 = arith.maximumf %13, %14 : vector<1x8xf32>
    %16 = arith.truncf %15 : vector<1x8xf32> to vector<1x8xbf16>
    %c8 = arith.constant 8 : index
    %c0_8 = arith.constant 0 : index
    %17 = vector.load %arg5[%c8, %c0_8] : memref<28x16xf32, #tpu.memory_space<vmem>>, vector<4x16xf32>
    %18 = arith.truncf %17 : vector<4x16xf32> to vector<4x16xbf16>
    %c12 = arith.constant 12 : index
    %c0_9 = arith.constant 0 : index
    %19 = vector.load %arg5[%c12, %c0_9] : memref<28x16xf32, #tpu.memory_space<vmem>>, vector<16x16xf32>
    %20 = arith.truncf %19 : vector<16x16xf32> to vector<16x16xbf16>
    %c0_10 = arith.constant 0 : index
    %c0_11 = arith.constant 0 : index
    %21 = vector.load %arg2[%c0_10, %c0_11] : memref<16x4xbf16, #tpu.memory_space<vmem>>, vector<16x4xbf16>
    %cst_12 = arith.constant dense<0.000000e+00> : vector<16x16xf32>
    %22 = tpu.matmul %21, %18, %cst_12 {dimension_numbers = #tpu.dot_dimension_numbers<[1], [0], [0], [1], [0, 0, 1, 1], [], []>} : vector<16x4xbf16>, vector<4x16xbf16>, vector<16x16xf32> -> vector<16x16xf32>
    %c3 = arith.constant 3 : index
    %c0_13 = arith.constant 0 : index
    %23 = vector.load %arg4[%c3, %c0_13] : memref<15x56xf32, #tpu.memory_space<vmem>>, vector<1x16xf32>
    %24 = vector.broadcast %23 : vector<1x16xf32> to vector<16x16xf32>
    %25 = arith.addf %22, %24 : vector<16x16xf32>
    %cst_14 = arith.constant 0.000000e+00 : f32
    %26 = vector.broadcast %cst_14 : f32 to vector<16x16xf32>
    %27 = arith.maximumf %25, %26 : vector<16x16xf32>
    %28 = arith.truncf %27 : vector<16x16xf32> to vector<16x16xbf16>
    %cst_15 = arith.constant dense<0.000000e+00> : vector<16x16xf32>
    %29 = tpu.matmul %28, %20, %cst_15 {dimension_numbers = #tpu.dot_dimension_numbers<[1], [0], [0], [1], [0, 0, 1, 1], [], []>} : vector<16x16xbf16>, vector<16x16xbf16>, vector<16x16xf32> -> vector<16x16xf32>
    %c4 = arith.constant 4 : index
    %c0_16 = arith.constant 0 : index
    %30 = vector.load %arg4[%c4, %c0_16] : memref<15x56xf32, #tpu.memory_space<vmem>>, vector<1x16xf32>
    %31 = vector.broadcast %30 : vector<1x16xf32> to vector<16x16xf32>
    %32 = arith.addf %29, %31 : vector<16x16xf32>
    %cst_17 = arith.constant 0.000000e+00 : f32
    %33 = vector.broadcast %cst_17 : f32 to vector<16x16xf32>
    %34 = arith.maximumf %32, %33 : vector<16x16xf32>
    %c0_18 = arith.constant 0 : index
    %c0_19 = arith.constant 0 : index
    %35 = vector.load %arg3[%c0_18, %c0_19] : memref<16x16xbf16, #tpu.memory_space<vmem>>, vector<16x16xbf16>
    %36 = arith.truncf %34 : vector<16x16xf32> to vector<16x16xbf16>
    %c0_20 = arith.constant 0 : index
    %c0_21 = arith.constant 0 : index
    %37 = vector.load %arg7[%c0_20, %c0_21] : memref<56x72xf32, #tpu.memory_space<vmem>>, vector<16x56xf32>
    %38 = arith.truncf %37 : vector<16x56xf32> to vector<16x56xbf16>
    %cst_22 = arith.constant dense<0.000000e+00> : vector<16x56xf32>
    %39 = tpu.matmul %36, %38, %cst_22 {dimension_numbers = #tpu.dot_dimension_numbers<[1], [0], [0], [1], [0, 0, 1, 1], [], []>} : vector<16x16xbf16>, vector<16x56xbf16>, vector<16x56xf32> -> vector<16x56xf32>
    %c0_23 = arith.constant 0 : index
    %c0_24 = arith.constant 0 : index
    %c0_25 = arith.constant 0 : index
    %40 = vector.load %arg6[%c0_23, %c0_24, %c0_25] : memref<2x24x16xf32, #tpu.memory_space<vmem>>, vector<1x24x16xf32>
    %41 = vector.shape_cast %40 : vector<1x24x16xf32> to vector<24x16xf32>
    %42 = vector.extract_strided_slice %41 {offsets = [0, 0], sizes = [16, 16], strides = [1, 1]} : vector<24x16xf32> to vector<16x16xf32>
    %43 = arith.truncf %42 : vector<16x16xf32> to vector<16x16xbf16>
    %44 = vector.extract_strided_slice %41 {offsets = [16, 0], sizes = [8, 16], strides = [1, 1]} : vector<24x16xf32> to vector<8x16xf32>
    %45 = arith.truncf %44 : vector<8x16xf32> to vector<8x16xbf16>
    %46 = arith.truncf %34 : vector<16x16xf32> to vector<16x16xbf16>
    %cst_26 = arith.constant dense<0.000000e+00> : vector<16x16xf32>
    %47 = tpu.matmul %35, %46, %cst_26 {dimension_numbers = #tpu.dot_dimension_numbers<[1], [0], [0], [1], [0, 0, 1, 1], [], []>} : vector<16x16xbf16>, vector<16x16xbf16>, vector<16x16xf32> -> vector<16x16xf32>
    %48 = arith.truncf %47 : vector<16x16xf32> to vector<16x16xbf16>
    %cst_27 = arith.constant dense<0.000000e+00> : vector<16x16xf32>
    %49 = tpu.matmul %48, %43, %cst_27 {dimension_numbers = #tpu.dot_dimension_numbers<[1], [0], [0], [1], [0, 0, 1, 1], [], []>} : vector<16x16xbf16>, vector<16x16xbf16>, vector<16x16xf32> -> vector<16x16xf32>
    %cst_28 = arith.constant dense<0.000000e+00> : vector<1x16xf32>
    %50 = tpu.matmul %16, %45, %cst_28 {dimension_numbers = #tpu.dot_dimension_numbers<[1], [0], [0], [1], [0, 0, 1, 1], [], []>} : vector<1x8xbf16>, vector<8x16xbf16>, vector<1x16xf32> -> vector<1x16xf32>
    %51 = vector.broadcast %50 : vector<1x16xf32> to vector<16x16xf32>
    %52 = arith.addf %49, %51 : vector<16x16xf32>
    %c5 = arith.constant 5 : index
    %c0_29 = arith.constant 0 : index
    %53 = vector.load %arg4[%c5, %c0_29] : memref<15x56xf32, #tpu.memory_space<vmem>>, vector<1x16xf32>
    %54 = vector.broadcast %53 : vector<1x16xf32> to vector<16x16xf32>
    %55 = arith.addf %52, %54 : vector<16x16xf32>
    %cst_30 = arith.constant 0.000000e+00 : f32
    %56 = vector.broadcast %cst_30 : f32 to vector<16x16xf32>
    %57 = arith.maximumf %55, %56 : vector<16x16xf32>
    %cst_31 = arith.constant dense<0.000000e+00> : vector<16xf32>
    %58 = vector.multi_reduction <add>, %57, %cst_31 [1] : vector<16x16xf32> to vector<16xf32>
    %59 = vector.shape_cast %58 : vector<16xf32> to vector<16x1xf32>
    %cst_32 = arith.constant 1.600000e+01 : f32
    %60 = vector.broadcast %cst_32 : f32 to vector<16x1xf32>
    %61 = arith.divf %59, %60 : vector<16x1xf32>
    %62 = vector.broadcast %61 : vector<16x1xf32> to vector<16x16xf32>
    %63 = arith.subf %57, %62 : vector<16x16xf32>
    %64 = arith.mulf %63, %63 : vector<16x16xf32>
    %cst_33 = arith.constant dense<0.000000e+00> : vector<16xf32>
    %65 = vector.multi_reduction <add>, %64, %cst_33 [1] : vector<16x16xf32> to vector<16xf32>
    %66 = vector.shape_cast %65 : vector<16xf32> to vector<16x1xf32>
    %cst_34 = arith.constant 1.600000e+01 : f32
    %67 = vector.broadcast %cst_34 : f32 to vector<16x1xf32>
    %68 = arith.divf %66, %67 : vector<16x1xf32>
    %cst_35 = arith.constant 9.99999974E-6 : f32
    %69 = vector.broadcast %cst_35 : f32 to vector<16x1xf32>
    %70 = arith.addf %68, %69 : vector<16x1xf32>
    %71 = math.rsqrt %70 : vector<16x1xf32>
    %c6 = arith.constant 6 : index
    %c0_36 = arith.constant 0 : index
    %72 = vector.load %arg4[%c6, %c0_36] : memref<15x56xf32, #tpu.memory_space<vmem>>, vector<1x16xf32>
    %73 = vector.broadcast %71 : vector<16x1xf32> to vector<16x16xf32>
    %74 = vector.broadcast %72 : vector<1x16xf32> to vector<16x16xf32>
    %75 = arith.mulf %73, %74 : vector<16x16xf32>
    %76 = arith.mulf %63, %75 : vector<16x16xf32>
    %c7 = arith.constant 7 : index
    %c0_37 = arith.constant 0 : index
    %77 = vector.load %arg4[%c7, %c0_37] : memref<15x56xf32, #tpu.memory_space<vmem>>, vector<1x16xf32>
    %78 = vector.broadcast %77 : vector<1x16xf32> to vector<16x16xf32>
    %79 = arith.addf %76, %78 : vector<16x16xf32>
    %80 = arith.truncf %79 : vector<16x16xf32> to vector<16x16xbf16>
    %c16 = arith.constant 16 : index
    %c0_38 = arith.constant 0 : index
    %81 = vector.load %arg7[%c16, %c0_38] : memref<56x72xf32, #tpu.memory_space<vmem>>, vector<16x56xf32>
    %82 = arith.truncf %81 : vector<16x56xf32> to vector<16x56xbf16>
    %cst_39 = arith.constant dense<0.000000e+00> : vector<16x56xf32>
    %83 = tpu.matmul %80, %82, %cst_39 {dimension_numbers = #tpu.dot_dimension_numbers<[1], [0], [0], [1], [0, 0, 1, 1], [], []>} : vector<16x16xbf16>, vector<16x56xbf16>, vector<16x56xf32> -> vector<16x56xf32>
    %84 = arith.addf %39, %83 : vector<16x56xf32>
    %c1_40 = arith.constant 1 : index
    %c0_41 = arith.constant 0 : index
    %c0_42 = arith.constant 0 : index
    %85 = vector.load %arg6[%c1_40, %c0_41, %c0_42] : memref<2x24x16xf32, #tpu.memory_space<vmem>>, vector<1x24x16xf32>
    %86 = vector.shape_cast %85 : vector<1x24x16xf32> to vector<24x16xf32>
    %87 = vector.extract_strided_slice %86 {offsets = [0, 0], sizes = [16, 16], strides = [1, 1]} : vector<24x16xf32> to vector<16x16xf32>
    %88 = arith.truncf %87 : vector<16x16xf32> to vector<16x16xbf16>
    %89 = vector.extract_strided_slice %86 {offsets = [16, 0], sizes = [8, 16], strides = [1, 1]} : vector<24x16xf32> to vector<8x16xf32>
    %90 = arith.truncf %89 : vector<8x16xf32> to vector<8x16xbf16>
    %91 = arith.truncf %79 : vector<16x16xf32> to vector<16x16xbf16>
    %cst_43 = arith.constant dense<0.000000e+00> : vector<16x16xf32>
    %92 = tpu.matmul %35, %91, %cst_43 {dimension_numbers = #tpu.dot_dimension_numbers<[1], [0], [0], [1], [0, 0, 1, 1], [], []>} : vector<16x16xbf16>, vector<16x16xbf16>, vector<16x16xf32> -> vector<16x16xf32>
    %93 = arith.truncf %92 : vector<16x16xf32> to vector<16x16xbf16>
    %cst_44 = arith.constant dense<0.000000e+00> : vector<16x16xf32>
    %94 = tpu.matmul %93, %88, %cst_44 {dimension_numbers = #tpu.dot_dimension_numbers<[1], [0], [0], [1], [0, 0, 1, 1], [], []>} : vector<16x16xbf16>, vector<16x16xbf16>, vector<16x16xf32> -> vector<16x16xf32>
    %cst_45 = arith.constant dense<0.000000e+00> : vector<1x16xf32>
    %95 = tpu.matmul %16, %90, %cst_45 {dimension_numbers = #tpu.dot_dimension_numbers<[1], [0], [0], [1], [0, 0, 1, 1], [], []>} : vector<1x8xbf16>, vector<8x16xbf16>, vector<1x16xf32> -> vector<1x16xf32>
    %96 = vector.broadcast %95 : vector<1x16xf32> to vector<16x16xf32>
    %97 = arith.addf %94, %96 : vector<16x16xf32>
    %c8_46 = arith.constant 8 : index
    %c0_47 = arith.constant 0 : index
    %98 = vector.load %arg4[%c8_46, %c0_47] : memref<15x56xf32, #tpu.memory_space<vmem>>, vector<1x16xf32>
    %99 = vector.broadcast %98 : vector<1x16xf32> to vector<16x16xf32>
    %100 = arith.addf %97, %99 : vector<16x16xf32>
    %cst_48 = arith.constant 0.000000e+00 : f32
    %101 = vector.broadcast %cst_48 : f32 to vector<16x16xf32>
    %102 = arith.maximumf %100, %101 : vector<16x16xf32>
    %cst_49 = arith.constant dense<0.000000e+00> : vector<16xf32>
    %103 = vector.multi_reduction <add>, %102, %cst_49 [1] : vector<16x16xf32> to vector<16xf32>
    %104 = vector.shape_cast %103 : vector<16xf32> to vector<16x1xf32>
    %cst_50 = arith.constant 1.600000e+01 : f32
    %105 = vector.broadcast %cst_50 : f32 to vector<16x1xf32>
    %106 = arith.divf %104, %105 : vector<16x1xf32>
    %107 = vector.broadcast %106 : vector<16x1xf32> to vector<16x16xf32>
    %108 = arith.subf %102, %107 : vector<16x16xf32>
    %109 = arith.mulf %108, %108 : vector<16x16xf32>
    %cst_51 = arith.constant dense<0.000000e+00> : vector<16xf32>
    %110 = vector.multi_reduction <add>, %109, %cst_51 [1] : vector<16x16xf32> to vector<16xf32>
    %111 = vector.shape_cast %110 : vector<16xf32> to vector<16x1xf32>
    %cst_52 = arith.constant 1.600000e+01 : f32
    %112 = vector.broadcast %cst_52 : f32 to vector<16x1xf32>
    %113 = arith.divf %111, %112 : vector<16x1xf32>
    %cst_53 = arith.constant 9.99999974E-6 : f32
    %114 = vector.broadcast %cst_53 : f32 to vector<16x1xf32>
    %115 = arith.addf %113, %114 : vector<16x1xf32>
    %116 = math.rsqrt %115 : vector<16x1xf32>
    %c9 = arith.constant 9 : index
    %c0_54 = arith.constant 0 : index
    %117 = vector.load %arg4[%c9, %c0_54] : memref<15x56xf32, #tpu.memory_space<vmem>>, vector<1x16xf32>
    %118 = vector.broadcast %116 : vector<16x1xf32> to vector<16x16xf32>
    %119 = vector.broadcast %117 : vector<1x16xf32> to vector<16x16xf32>
    %120 = arith.mulf %118, %119 : vector<16x16xf32>
    %121 = arith.mulf %108, %120 : vector<16x16xf32>
    %c10 = arith.constant 10 : index
    %c0_55 = arith.constant 0 : index
    %122 = vector.load %arg4[%c10, %c0_55] : memref<15x56xf32, #tpu.memory_space<vmem>>, vector<1x16xf32>
    %123 = vector.broadcast %122 : vector<1x16xf32> to vector<16x16xf32>
    %124 = arith.addf %121, %123 : vector<16x16xf32>
    %125 = arith.truncf %124 : vector<16x16xf32> to vector<16x16xbf16>
    %c32 = arith.constant 32 : index
    %c0_56 = arith.constant 0 : index
    %126 = vector.load %arg7[%c32, %c0_56] : memref<56x72xf32, #tpu.memory_space<vmem>>, vector<16x56xf32>
    %127 = arith.truncf %126 : vector<16x56xf32> to vector<16x56xbf16>
    %cst_57 = arith.constant dense<0.000000e+00> : vector<16x56xf32>
    %128 = tpu.matmul %125, %127, %cst_57 {dimension_numbers = #tpu.dot_dimension_numbers<[1], [0], [0], [1], [0, 0, 1, 1], [], []>} : vector<16x16xbf16>, vector<16x56xbf16>, vector<16x56xf32> -> vector<16x56xf32>
    %129 = arith.addf %84, %128 : vector<16x56xf32>
    %c48 = arith.constant 48 : index
    %c0_58 = arith.constant 0 : index
    %130 = vector.load %arg7[%c48, %c0_58] : memref<56x72xf32, #tpu.memory_space<vmem>>, vector<8x56xf32>
    %131 = arith.truncf %130 : vector<8x56xf32> to vector<8x56xbf16>
    %cst_59 = arith.constant dense<0.000000e+00> : vector<1x56xf32>
    %132 = tpu.matmul %16, %131, %cst_59 {dimension_numbers = #tpu.dot_dimension_numbers<[1], [0], [0], [1], [0, 0, 1, 1], [], []>} : vector<1x8xbf16>, vector<8x56xbf16>, vector<1x56xf32> -> vector<1x56xf32>
    %133 = vector.broadcast %132 : vector<1x56xf32> to vector<16x56xf32>
    %134 = arith.addf %129, %133 : vector<16x56xf32>
    %c11 = arith.constant 11 : index
    %c0_60 = arith.constant 0 : index
    %135 = vector.load %arg4[%c11, %c0_60] : memref<15x56xf32, #tpu.memory_space<vmem>>, vector<1x56xf32>
    %136 = vector.broadcast %135 : vector<1x56xf32> to vector<16x56xf32>
    %137 = arith.addf %134, %136 : vector<16x56xf32>
    %cst_61 = arith.constant 0.000000e+00 : f32
    %138 = vector.broadcast %cst_61 : f32 to vector<16x56xf32>
    %139 = arith.maximumf %137, %138 : vector<16x56xf32>
    %c0_62 = arith.constant 0 : index
    %c56 = arith.constant 56 : index
    %140 = vector.load %arg7[%c0_62, %c56] : memref<56x72xf32, #tpu.memory_space<vmem>>, vector<56x16xf32>
    %141 = arith.truncf %140 : vector<56x16xf32> to vector<56x16xbf16>
    %142 = arith.truncf %139 : vector<16x56xf32> to vector<16x56xbf16>
    %cst_63 = arith.constant dense<0.000000e+00> : vector<16x16xf32>
    %143 = tpu.matmul %142, %141, %cst_63 {dimension_numbers = #tpu.dot_dimension_numbers<[1], [0], [0], [1], [0, 0, 1, 1], [], []>} : vector<16x56xbf16>, vector<56x16xbf16>, vector<16x16xf32> -> vector<16x16xf32>
    %c12_64 = arith.constant 12 : index
    %c0_65 = arith.constant 0 : index
    %144 = vector.load %arg4[%c12_64, %c0_65] : memref<15x56xf32, #tpu.memory_space<vmem>>, vector<1x16xf32>
    %145 = vector.broadcast %144 : vector<1x16xf32> to vector<16x16xf32>
    %146 = arith.addf %143, %145 : vector<16x16xf32>
    %c0_66 = arith.constant 0 : index
    %c0_67 = arith.constant 0 : index
    %147 = vector.load %arg10[%c0_66, %c0_67] : memref<16x16xf32, #tpu.memory_space<vmem>>, vector<16x16xf32>
    tpu.vector_store %arg10[%c0_66, %c0_67], %146 {strides = array<i32>} : memref<16x16xf32, #tpu.memory_space<vmem>>, vector<16x16xf32>,
    %c0_68 = arith.constant 0 : index
    %148 = memref.load %arg1[%c0_68] : memref<16xi32, #tpu.memory_space<smem>>
    %149 = arith.index_cast %148 : i32 to index
    %c0_69 = arith.constant 0 : index
    %150 = vector.load %arg10[%149, %c0_69] : memref<16x16xf32, #tpu.memory_space<vmem>>, vector<1x16xf32>
    %c8_70 = arith.constant 8 : index
    %151 = memref.load %arg1[%c8_70] : memref<16xi32, #tpu.memory_space<smem>>
    %152 = arith.index_cast %151 : i32 to index
    %c0_71 = arith.constant 0 : index
    %153 = vector.load %arg10[%152, %c0_71] : memref<16x16xf32, #tpu.memory_space<vmem>>, vector<1x16xf32>
    %154 = arith.mulf %150, %153 : vector<1x16xf32>
    %c1_72 = arith.constant 1 : index
    %155 = memref.load %arg1[%c1_72] : memref<16xi32, #tpu.memory_space<smem>>
    %156 = arith.index_cast %155 : i32 to index
    %c0_73 = arith.constant 0 : index
    %157 = vector.load %arg10[%156, %c0_73] : memref<16x16xf32, #tpu.memory_space<vmem>>, vector<1x16xf32>
    %c9_74 = arith.constant 9 : index
    %158 = memref.load %arg1[%c9_74] : memref<16xi32, #tpu.memory_space<smem>>
    %159 = arith.index_cast %158 : i32 to index
    %c0_75 = arith.constant 0 : index
    %160 = vector.load %arg10[%159, %c0_75] : memref<16x16xf32, #tpu.memory_space<vmem>>, vector<1x16xf32>
    %161 = arith.mulf %157, %160 : vector<1x16xf32>
    %c2_76 = arith.constant 2 : index
    %162 = memref.load %arg1[%c2_76] : memref<16xi32, #tpu.memory_space<smem>>
    %163 = arith.index_cast %162 : i32 to index
    %c0_77 = arith.constant 0 : index
    %164 = vector.load %arg10[%163, %c0_77] : memref<16x16xf32, #tpu.memory_space<vmem>>, vector<1x16xf32>
    %c10_78 = arith.constant 10 : index
    %165 = memref.load %arg1[%c10_78] : memref<16xi32, #tpu.memory_space<smem>>
    %166 = arith.index_cast %165 : i32 to index
    %c0_79 = arith.constant 0 : index
    %167 = vector.load %arg10[%166, %c0_79] : memref<16x16xf32, #tpu.memory_space<vmem>>, vector<1x16xf32>
    %168 = arith.mulf %164, %167 : vector<1x16xf32>
    %c3_80 = arith.constant 3 : index
    %169 = memref.load %arg1[%c3_80] : memref<16xi32, #tpu.memory_space<smem>>
    %170 = arith.index_cast %169 : i32 to index
    %c0_81 = arith.constant 0 : index
    %171 = vector.load %arg10[%170, %c0_81] : memref<16x16xf32, #tpu.memory_space<vmem>>, vector<1x16xf32>
    %c11_82 = arith.constant 11 : index
    %172 = memref.load %arg1[%c11_82] : memref<16xi32, #tpu.memory_space<smem>>
    %173 = arith.index_cast %172 : i32 to index
    %c0_83 = arith.constant 0 : index
    %174 = vector.load %arg10[%173, %c0_83] : memref<16x16xf32, #tpu.memory_space<vmem>>, vector<1x16xf32>
    %175 = arith.mulf %171, %174 : vector<1x16xf32>
    %c4_84 = arith.constant 4 : index
    %176 = memref.load %arg1[%c4_84] : memref<16xi32, #tpu.memory_space<smem>>
    %177 = arith.index_cast %176 : i32 to index
    %c0_85 = arith.constant 0 : index
    %178 = vector.load %arg10[%177, %c0_85] : memref<16x16xf32, #tpu.memory_space<vmem>>, vector<1x16xf32>
    %c12_86 = arith.constant 12 : index
    %179 = memref.load %arg1[%c12_86] : memref<16xi32, #tpu.memory_space<smem>>
    %180 = arith.index_cast %179 : i32 to index
    %c0_87 = arith.constant 0 : index
    %181 = vector.load %arg10[%180, %c0_87] : memref<16x16xf32, #tpu.memory_space<vmem>>, vector<1x16xf32>
    %182 = arith.mulf %178, %181 : vector<1x16xf32>
    %c5_88 = arith.constant 5 : index
    %183 = memref.load %arg1[%c5_88] : memref<16xi32, #tpu.memory_space<smem>>
    %184 = arith.index_cast %183 : i32 to index
    %c0_89 = arith.constant 0 : index
    %185 = vector.load %arg10[%184, %c0_89] : memref<16x16xf32, #tpu.memory_space<vmem>>, vector<1x16xf32>
    %c13 = arith.constant 13 : index
    %186 = memref.load %arg1[%c13] : memref<16xi32, #tpu.memory_space<smem>>
    %187 = arith.index_cast %186 : i32 to index
    %c0_90 = arith.constant 0 : index
    %188 = vector.load %arg10[%187, %c0_90] : memref<16x16xf32, #tpu.memory_space<vmem>>, vector<1x16xf32>
    %189 = arith.mulf %185, %188 : vector<1x16xf32>
    %c6_91 = arith.constant 6 : index
    %190 = memref.load %arg1[%c6_91] : memref<16xi32, #tpu.memory_space<smem>>
    %191 = arith.index_cast %190 : i32 to index
    %c0_92 = arith.constant 0 : index
    %192 = vector.load %arg10[%191, %c0_92] : memref<16x16xf32, #tpu.memory_space<vmem>>, vector<1x16xf32>
    %c14 = arith.constant 14 : index
    %193 = memref.load %arg1[%c14] : memref<16xi32, #tpu.memory_space<smem>>
    %194 = arith.index_cast %193 : i32 to index
    %c0_93 = arith.constant 0 : index
    %195 = vector.load %arg10[%194, %c0_93] : memref<16x16xf32, #tpu.memory_space<vmem>>, vector<1x16xf32>
    %196 = arith.mulf %192, %195 : vector<1x16xf32>
    %c7_94 = arith.constant 7 : index
    %197 = memref.load %arg1[%c7_94] : memref<16xi32, #tpu.memory_space<smem>>
    %198 = arith.index_cast %197 : i32 to index
    %c0_95 = arith.constant 0 : index
    %199 = vector.load %arg10[%198, %c0_95] : memref<16x16xf32, #tpu.memory_space<vmem>>, vector<1x16xf32>
    %c15 = arith.constant 15 : index
    %200 = memref.load %arg1[%c15] : memref<16xi32, #tpu.memory_space<smem>>
    %201 = arith.index_cast %200 : i32 to index
    %c0_96 = arith.constant 0 : index
    %202 = vector.load %arg10[%201, %c0_96] : memref<16x16xf32, #tpu.memory_space<vmem>>, vector<1x16xf32>
    %203 = arith.mulf %199, %202 : vector<1x16xf32>
    %204 = tpu.concatenate %154, %161, %168, %175, %182, %189, %196, %203 in 0 : vector<1x16xf32>, vector<1x16xf32>, vector<1x16xf32>, vector<1x16xf32>, vector<1x16xf32>, vector<1x16xf32>, vector<1x16xf32>, vector<1x16xf32> -> vector<8x16xf32>
    %c0_97 = arith.constant 0 : index
    %c0_98 = arith.constant 0 : index
    %205 = vector.load %arg8[%c0_97, %c0_98] : memref<16x19xf32, #tpu.memory_space<vmem>>, vector<16x16xf32>
    %206 = arith.truncf %205 : vector<16x16xf32> to vector<16x16xbf16>
    %c0_99 = arith.constant 0 : index
    %c16_100 = arith.constant 16 : index
    %207 = vector.load %arg8[%c0_99, %c16_100] : memref<16x19xf32, #tpu.memory_space<vmem>>, vector<16x3xf32>
    %208 = arith.truncf %207 : vector<16x3xf32> to vector<16x3xbf16>
    %209 = arith.truncf %204 : vector<8x16xf32> to vector<8x16xbf16>
    %cst_101 = arith.constant dense<0.000000e+00> : vector<8x16xf32>
    %210 = tpu.matmul %209, %206, %cst_101 {dimension_numbers = #tpu.dot_dimension_numbers<[1], [0], [0], [1], [0, 0, 1, 1], [], []>} : vector<8x16xbf16>, vector<16x16xbf16>, vector<8x16xf32> -> vector<8x16xf32>
    %c13_102 = arith.constant 13 : index
    %c0_103 = arith.constant 0 : index
    %211 = vector.load %arg4[%c13_102, %c0_103] : memref<15x56xf32, #tpu.memory_space<vmem>>, vector<1x16xf32>
    %212 = vector.broadcast %211 : vector<1x16xf32> to vector<8x16xf32>
    %213 = arith.addf %210, %212 : vector<8x16xf32>
    %cst_104 = arith.constant 0.000000e+00 : f32
    %214 = vector.broadcast %cst_104 : f32 to vector<8x16xf32>
    %215 = arith.maximumf %213, %214 : vector<8x16xf32>
    %216 = arith.truncf %215 : vector<8x16xf32> to vector<8x16xbf16>
    %cst_105 = arith.constant dense<0.000000e+00> : vector<8x3xf32>
    %217 = tpu.matmul %216, %208, %cst_105 {dimension_numbers = #tpu.dot_dimension_numbers<[1], [0], [0], [1], [0, 0, 1, 1], [], []>} : vector<8x16xbf16>, vector<16x3xbf16>, vector<8x3xf32> -> vector<8x3xf32>
    %c14_106 = arith.constant 14 : index
    %c0_107 = arith.constant 0 : index
    %218 = vector.load %arg4[%c14_106, %c0_107] : memref<15x56xf32, #tpu.memory_space<vmem>>, vector<1x3xf32>
    %219 = vector.broadcast %218 : vector<1x3xf32> to vector<8x3xf32>
    %220 = arith.addf %217, %219 : vector<8x3xf32>
    %c0_108 = arith.constant 0 : index
    %c0_109 = arith.constant 0 : index
    %221 = vector.load %arg9[%c0_108, %c0_109] : memref<8x3xf32, #tpu.memory_space<vmem>>, vector<8x3xf32>
    tpu.vector_store %arg9[%c0_108, %c0_109], %220 {strides = array<i32>} : memref<8x3xf32, #tpu.memory_space<vmem>>, vector<8x3xf32>,
    return
  }
}

</mosaic_0001>

<bundles_post_ra>
// kernel: tpu_custom_call.1
= control target key start
LH: loop header
LB: loop body
LE: loop exit
PB: predicated region body
PF: predicated region fallthrough
CT: control target
= control target key end

     0   :  { %15 = vsyncpa [#allocation5], 0  ;;  %s1665_s0 = inlined_call_operand.<no memory space> [shape: f32[1], index: 0, kind: input, shape index: {}]   ;;  %s1666_s1 = inlined_call_operand.vmem [shape: s32[16], index: 1, kind: input, shape index: {}]   ;;  %s1667_s2 = inlined_call_operand.vmem [shape: bf16[16,4], index: 2, kind: input, shape index: {}]   ;;  %s1668_s3 = inlined_call_operand.vmem [shape: bf16[16,16], index: 3, kind: input, shape index: {}]   ;;  %s1669_s4 = inlined_call_operand.vmem [shape: f32[15,56], index: 4, kind: input, shape index: {}]   ;;  %s1670_s5 = inlined_call_operand.vmem [shape: f32[28,16], index: 5, kind: input, shape index: {}]   ;;  %s1671_s6 = inlined_call_operand.vmem [shape: f32[2,24,16], index: 6, kind: input, shape index: {}]   ;;  %s1672_s7 = inlined_call_operand.vmem [shape: f32[56,72], index: 7, kind: input, shape index: {}]   ;;  %s1673_s8 = inlined_call_operand.vmem [shape: f32[16,19], index: 8, kind: input, shape index: {}]   ;;  %s1674_s9 = inlined_call_operand.vmem [shape: f32[8,3], index: 9, kind: output, shape index: {}]  }
   0x1   :  { %s24_s11 = sshll.u32 %s1666_s1, 4  ;;  %s25_s11 = int_to_ptr.vmem [resolvable:$true] %s24_s11 }
   0x2   :  { %s1322_s12 = scalar_lea.vmem %s25_s11, 16  ;;  %p1327_p1 = scmp.lt.s32.totalorder %s25_s11, %s25_s11 }
   0x3   :  { %p1323_p0 = scmp.ne.s32.totalorder %s25_s11, %s1322_s12  ;;  %p1328_p2 = scmp.lt.s32.totalorder %s1322_s12, %s1322_s12 }
   0x5   :  { %p1329_p3 = por %p1328_p2, %p1327_p1 }
   0x7   :  { %p1330_p4 = pnand %p1329_p3, %p1323_p0 }
   0x9   :  { %1333 = shalt.err (!%p1330_p4)
}
   0xa   :  { %s1336_s13 = smov [#allocation4]  }
   0xb   :  { %27 = dma.vmem_to_smem %s25_s11, 16, %s1336_s13, [#allocation5]  }
   0xc   :  { %1334 = dma.done.wait [#allocation5], 16  }
   0xd   :  { %1335 = vsyncadd [#allocation5], 4294967280 }
   0xe   :  { %45 = sfence }
   0xf   :  { %v108_v0 = vld [vmem:[%s1670_s5 + $0x8] sm:$0xf]  ;;  %vm129_vm0 = vcmask 1041408   ;;  %v49_v1 = vstv %s1665_s0  ;;  %v1337_v2 = vmov 0.0   ;;  %vm1338_vm1 = vmmov 0   ;;  %v54_v4 = vld [vmem:[%s1670_s5] sm:$0xff] }
  0x10   :  { %1211 = vmatprep.subr.bf16.mxu1 %v1337_v2  ;;  %v109_v3 = vpack.c.bf16 %v108_v0, %v108_v0  ;;  %1213 = vmatprep.mubr.msk.bf16.mxu1 %vm1338_vm1, %v1337_v2  ;;  %v55_v5 = vpack.c.bf16 %v54_v4, %v54_v4  ;;  %vm62_vm2 = vcmask 1043456   ;;  %v48_v6 = vld [vmem:[%s1669_s4] sm:$0x1]  ;;  %v51_v7 = vld [vmem:[%s1669_s4 + $0x1] sm:$0x1]  ;;  %vm125_vm3 = vcmask 31744  }
  0x11   :  { %1205 = vmatprep.subr.bf16.mxu0 %v1337_v2  ;;  %1207 = vmatprep.mubr.msk.bf16.mxu0 %vm1338_vm1, %v1337_v2  ;;  %v1312_v9 = vld [vmem:[%s1667_s2] sm:$0xff]   ;;  %v50_v10 = vmul.f32 %v49_v1, %v48_v6  ;;  %vm58_vm4 = vcmask 64512   ;;  %v110_v15 = vld [vmem:[%s1670_s5 + $0xc] sm:$0xff]  ;;  %v111_v16 = vld [vmem:[%s1670_s5 + $0x14] sm:$0xff]  ;;  %vm182_vm5 = vcmask 130048   ;;  %s1339_s18 = smov 72  }
  0x12   :  { %v131_v8 = vsel %vm129_vm0, %v109_v3, 0  ;;  %v64_v11 = vsel %vm62_vm2, %v55_v5, 0  ;;  %v112_v17 = vpack.c.bf16 %v111_v16, %v110_v15  ;;  %v1123_v18 = vld [vmem:[%s1669_s4 + $0x3] ss:$0 sm:$0xff]  ;;  %v237_v20 = vld [vmem:[%s1671_s6 + $0x10] sm:$0xff]  ;;  %v236_v55 = vld [vmem:[%s1671_s6 + $0x8] sm:$0xff]  ;;  %v336_v5 = vlaneseq }
  0x13   :  { %1212 = vmatpush3.bf16.msra.mxu1 %v131_v8  ;;  %1206 = vmatpush3.bf16.msra.mxu0 %v64_v11  ;;  %v52_v12 = vadd.f32 %v51_v7, %v50_v10  ;;  %v57_v24 = vld [vmem:[%s1669_s4 + $0x2] sm:$0x1]  ;;  %v239_v27 = vpack.c.bf16 %v237_v20, %v237_v20  ;;  %v1126_v39 = vld [vmem:[%s1669_s4 + $0x4] ss:$0 sm:$0xff]  ;;  %v233_v58 = vld [vmem:[%s1672_s7 + $0x8] sm:$0xff]  ;;  %vm854_vm6 = vcmask 457728  }
  0x14   :  { %1223 = vmatprep.subr.bf16.mxu1 %v1337_v2  ;;  %1217 = vmatprep.subr.bf16.mxu0 %v1337_v2  ;;  %v1460_v49 = vld [vmem:[%s1668_s3] sm:$0xff]   ;;  %v1139_v1 = vld [vmem:[%s1671_s6 + $0x28] sm:$0xff]  ;;  %v337_v6 = vshrl.u32 %v336_v5, 7  ;;  %s1340_s26 = smov 112   ;;  %s904_s27 = sld [smem:[#allocation4]]  ;;  %vm981_vm7 = vcmask 1040384  }
  0x15   :  { %v53_v13 = vmax.f32 %v52_v12, 0.0  ;;  %v294_v36 = vsel %vm62_vm2, %v239_v27, 0  ;;  %v235_v54 = vld [vmem:[%s1671_s6] sm:$0xff]  ;;  %v531_v3 = vpack.c.bf16 %v1139_v1, %v1139_v1  ;;  %s1151_s28 = sld [smem:[#allocation4 + $0x8]]  ;;  %s1602_s29 = sld [smem:[#allocation4 + $0x1]]  ;;  %vm984_vm8 = vcmask 1042432  }
  0x16   :  { %1214 = vmatmul.mubr.msk.bf16.vlgmr.msra.gmra.mrb[0].mxu1 %vm125_vm3, %v1312_v9  ;;  %v238_v56 = vpack.c.bf16 %v236_v55, %v235_v54  ;;  %v232_v57 = vld [vmem:[%s1672_s7] sm:$0xff]  ;;  %v1499_v7 = vsub.s32 0, %v337_v6  ;;  %s1604_s30 = sld [smem:[#allocation4 + $0x9]]  ;;  %s1609_s5 = sld [smem:[#allocation4 + $0x2]]  ;;  %vm987_vm9 = vcmask 1044480   ;;  %vm989_vm10 = vcmask 1045504  }
  0x17   :  { %1225 = vmatprep.mubr.msk.bf16.mxu1 %vm1338_vm1, %v1337_v2  ;;  %v56_v14 = vpack.c.bf16 %v53_v13, %v53_v13  ;;  %v1480_v62 = vpack.c.bf16 %v233_v58, %v232_v57  ;;  %v575_v4 = vsel %vm62_vm2, %v531_v3, 0  ;;  %v1132_v10 = vld [vmem:[%s1669_s4 + $0x5] ss:$0 sm:$0xff]  ;;  %v1134_v57 = vld [vmem:[%s1669_s4 + $0x7] ss:$0 sm:$0xff]  ;;  %s1611_s12 = sld [smem:[#allocation4 + $0xa]] }
  0x18   :  { %s1615_s13 = sld [smem:[#allocation4 + $0xb]]  ;;  %s1617_s14 = sld [smem:[#allocation4 + $0x4]]  ;;  %vm991_vm11 = vcmask 1046528   ;;  %vm1099_vm12 = vcmask 23552  }
  0x19   :  { %1208 = vmatmul.mubr.msk.bf16.vlgmr.msra.gmra.mrb[0].mxu0 %vm58_vm4, %v56_v14  ;;  %s1621_s15 = sld [smem:[#allocation4 + $0x5]]  ;;  %s1625_s1 = sld [smem:[#allocation4 + $0x6]] }
  0x1a   :  { %1219 = vmatprep.mubr.msk.bf16.mxu0 %vm1338_vm1, %v1337_v2  ;;  %1218 = vmatpush3.bf16.msra.mxu0 %v112_v17  ;;  %s1623_s16 = sld [smem:[#allocation4 + $0xd]]  ;;  %s1627_s3 = sld [smem:[#allocation4 + $0xe]] }
  0x1b   :  { %1229 = vmatprep.subr.bf16.mxu0 %v1337_v2  ;;  %s1630_s17 = sld [smem:[#allocation4 + $0x7]]  ;;  %s908_s0 = scalar_lea.vmem [#allocation2], %s1151_s28 }
  0x1c   :  { %s912_s19 = scalar_lea.vmem [#allocation2], %s1602_s29  ;;  %s915_s20 = scalar_lea.vmem [#allocation2], %s1604_s30 }
  0x1d   :  { %s919_s21 = scalar_lea.vmem [#allocation2], %s1609_s5  ;;  %s922_s22 = scalar_lea.vmem [#allocation2], %s1611_s12 }
  0x1e   :  { %s929_s2 = scalar_lea.vmem [#allocation2], %s1615_s13  ;;  %s933_s24 = scalar_lea.vmem [#allocation2], %s1617_s14 }
  0x1f   :  { %s947_s28 = scalar_lea.vmem [#allocation2], %s1625_s1 }
  0x20   :  { %s950_s29 = scalar_lea.vmem [#allocation2], %s1627_s3 }
  0x21   :  { %s954_s30 = scalar_lea.vmem [#allocation2], %s1630_s17 }
  0xe9   :  { %v167_v19 = vpop.f32.mrb[0].mxu1 }
  0xea   :  { %v168_v21 = vadd.f32 %v1123_v18, %v167_v19  ;;  %v1215_v22 = vpop.f32.mrb[1].mxu1 }
  0xeb   :  { %v170_v23 = vpop.f32.mrb[2].mxu1 }
  0xec   :  { %v171_v25 = vadd.f32 %v1123_v18, %v170_v23  ;;  %v1216_v26 = vpop.f32.mrb[3].mxu1  ;;  %v100_v28 = vpop.f32.mrb[0].mxu0  ;;  %v174_v29 = vmax.f32 %v168_v21, 0.0 }
  0xed   :  { %v101_v31 = vadd.f32 %v100_v28, %v57_v24  ;;  %v1209_v32 = vpop.f32.mrb[1].mxu0 }
  0xee   :  { %v175_v30 = vmax.f32 %v171_v25, 0.0  ;;  %v103_v33 = vpop.f32.mrb[2].mxu0 }
  0xef   :  { %v1210_v35 = vpop.f32.mrb[3].mxu0  ;;  %v106_v37 = vmax.f32 %v101_v31, 0.0 }
  0xf0   :  { %v176_v34 = vpack.c.bf16 %v175_v30, %v174_v29 }
  0xf1   :  { %v1448_v38 = vpack.c.bf16 %v106_v37, %v106_v37 }
  0xf2   :  { %1220 = vmatmul.mubr.msk.bf16.vlgmr.msra.gmra.mrb[4].mxu0 %vm182_vm5, %v176_v34 }
  0xf3   :  { %1230 = vmatpush3.bf16.msra.mxu0 %v294_v36  ;;  %1231 = vmatprep.mubr.msk.bf16.mxu0 %vm1338_vm1, %v1337_v2 }
  0xf4   :  { %1241 = vmatprep.subr.bf16.mxu0 %v1337_v2 }
  0xfa   :  { %1232 = vmatmul.mubr.msk.bf16.vlgmr.msra.gmra.mrb[8].mxu0 %vm58_vm4, %v1448_v38 }
  0xfb   :  { %1243 = vmatprep.mubr.msk.bf16.mxu0 %vm1338_vm1, %v1337_v2 }
 0x1c5   :  { %v220_v40 = vpop.f32.mrb[4].mxu0 }
 0x1c6   :  { %v221_v41 = vadd.f32 %v1126_v39, %v220_v40  ;;  %v1221_v42 = vpop.f32.mrb[5].mxu0 }
 0x1c7   :  { %v223_v43 = vpop.f32.mrb[6].mxu0  ;;  %v436_v42 = vld [vmem:[%s1672_s7 + $0x18] sm:$0xff] }
 0x1c8   :  { %v224_v44 = vadd.f32 %v1126_v39, %v223_v43  ;;  %v1222_v45 = vpop.f32.mrb[7].mxu0  ;;  %v227_v46 = vmax.f32 %v221_v41, 0.0  ;;  %v435_v41 = vld [vmem:[%s1672_s7 + $0x10] sm:$0xff] }
 0x1c9   :  { %v1517_v43 = vpack.c.bf16 %v436_v42, %v435_v41 }
 0x1ca   :  { %v228_v47 = vmax.f32 %v224_v44, 0.0 }
 0x1cb   :  { %1242 = vmatpush3.bf16.msra.mxu0 %v1517_v43 }
 0x1cc   :  { %v231_v48 = vpack.c.bf16 %v228_v47, %v227_v46  ;;  %1253 = vmatprep.subr.bf16.mxu0 %v1337_v2 }
 0x1cd   :  { %v330_v50 = vpop.f32.mrb[8].mxu0 }
 0x1ce   :  { %1224 = vmatpush3.bf16.msra.mxu1 %v231_v48  ;;  %v1233_v51 = vpop.f32.mrb[9].mxu0  ;;  %v339_v8 = vrot.slane %v330_v50, %v1499_v7 }
 0x1cf   :  { %v333_v52 = vpop.f32.mrb[10].mxu0  ;;  %1235 = vmatprep.subr.bf16.mxu1 %v1337_v2  ;;  %v1133_v51 = vld [vmem:[%s1669_s4 + $0x6] ss:$0 sm:$0xff] }
 0x1d0   :  { %v1234_v53 = vpop.f32.mrb[11].mxu0 }
 0x1d1   :  { %1226 = vmatmul.mubr.msk.bf16.vlgmr.msra.gmra.mrb[4].mxu1 %vm182_vm5, %v1460_v49 }
 0x1d2   :  { %1237 = vmatprep.mubr.msk.bf16.mxu1 %vm1338_vm1, %v1337_v2  ;;  %1236 = vmatpush3.bf16.msra.mxu1 %v238_v56 }
 0x1d3   :  { %1247 = vmatprep.subr.bf16.mxu1 %v1337_v2 }
 0x2a4   :  { %v282_v59 = vpop.f32.mrb[4].mxu1 }
 0x2a5   :  { %v1227_v60 = vpop.f32.mrb[5].mxu1 }
 0x2a6   :  { %v285_v61 = vpop.f32.mrb[6].mxu1 }
 0x2a7   :  { %v289_v63 = vpack.c.bf16 %v285_v61, %v282_v59  ;;  %v1228_v0 = vpop.f32.mrb[7].mxu1 }
 0x2a8   :  { %v1138_v0 = vld [vmem:[%s1671_s6 + $0x20] sm:$0xff] }
 0x2a9   :  { %1238 = vmatmul.mubr.msk.bf16.vlgmr.msra.gmra.mrb[8].mxu1 %vm182_vm5, %v289_v63  ;;  %v1137_v63 = vld [vmem:[%s1671_s6 + $0x18] sm:$0xff]  ;;  %s1619_s6 = sld [smem:[#allocation4 + $0xc]] }
 0x2aa   :  { %1248 = vmatpush3.bf16.msra.mxu1 %v1480_v62  ;;  %1249 = vmatprep.mubr.msk.bf16.mxu1 %vm1338_vm1, %v1337_v2  ;;  %v530_v1 = vpack.c.bf16 %v1138_v0, %v1137_v63 }
 0x2ab   :  { %1259 = vmatprep.subr.bf16.mxu1 %v1337_v2 }
 0x2af   :  { %s936_s25 = scalar_lea.vmem [#allocation2], %s1619_s6 }
 0x2b1   :  { %1250 = vmatmul.mubr.msk.bf16.vlgmr.msra.gmra.mrb[12].mxu1 %vm182_vm5, %v231_v48 }
 0x2b2   :  { %1260 = vmatpush3.bf16.msra.mxu1 %v575_v4  ;;  %1261 = vmatprep.mubr.msk.bf16.mxu1 %vm1338_vm1, %v1337_v2 }
 0x2b3   :  { %1271 = vmatprep.subr.bf16.mxu1 %v1337_v2 }
 0x2b9   :  { %1262 = vmatmul.mubr.msk.bf16.vlgmr.msra.gmra.mrb[16].mxu1 %vm58_vm4, %v1448_v38 }
 0x2ba   :  { %1273 = vmatprep.mubr.msk.bf16.mxu1 %vm1338_vm1, %v1337_v2 }
 0x37c   :  { %v377_v9 = vpop.f32.mrb[8].mxu1 }
 0x37d   :  { %v378_v11 = vadd.f32 %v377_v9, %v339_v8  ;;  %v1239_v12 = vpop.f32.mrb[9].mxu1  ;;  %v764_v9 = vld [vmem:[%s1672_s7 + $0x30] sm:$0xff] }
 0x37e   :  { %v380_v13 = vpop.f32.mrb[10].mxu1 }
 0x37f   :  { %v381_v14 = vadd.f32 %v380_v13, %v339_v8  ;;  %v1240_v15 = vpop.f32.mrb[11].mxu1  ;;  %v389_v16 = vadd.f32 %v1132_v10, %v378_v11 }
 0x381   :  { %v390_v17 = vadd.f32 %v1132_v10, %v381_v14  ;;  %v391_v18 = vmax.f32 %v389_v16, 0.0  ;;  %v765_v10 = vpack.c.bf16 %v764_v9, %v764_v9 }
 0x383   :  { %v393_v19 = vsel %vm182_vm5, %v391_v18, 0.0  ;;  %v392_v20 = vmax.f32 %v390_v17, 0.0  ;;  %v767_v16 = vsel %vm62_vm2, %v765_v10, 0 }
 0x384   :  { %v519_v21 = vpop.f32.mrb[12].mxu1  ;;  %394 = vadd.xlane.f32.xlu0 %v393_v19  ;;  %v1143_v19 = vld [vmem:[%s1669_s4 + $0x8] ss:$0 sm:$0xff] }
 0x385   :  { %v1251_v22 = vpop.f32.mrb[13].mxu1  ;;  %v396_v25 = vsel %vm182_vm5, %v392_v20, 0.0 }
 0x386   :  { %v522_v23 = vpop.f32.mrb[14].mxu1 }
 0x387   :  { %v1252_v24 = vpop.f32.mrb[15].mxu1 }
 0x388   :  { %397 = vadd.xlane.f32.xlu0 %v396_v25 }
 0x38c   :  { %v1507_v26 = vpop.f32.mrb[16].mxu1 }
 0x38d   :  { %v1263_v27 = vpop.f32.mrb[17].mxu1  ;;  %v620_v17 = vrot.slane %v1507_v26, %v1499_v7 }
 0x38e   :  { %v614_v28 = vpop.f32.mrb[18].mxu1 }
 0x38f   :  { %v1264_v29 = vpop.f32.mrb[19].mxu1 }
 0x411   :  { %v395_v30 = vpop.xlane.xlu0 %394 }
 0x412   :  { %v400_v31 = vmul.f32 0.0625, %v395_v30 }
 0x414   :  { %v402_v32 = vsub.f32 %v391_v18, %v400_v31 }
 0x415   :  { %v398_v33 = vpop.xlane.xlu0 %397 }
 0x416   :  { %v401_v34 = vmul.f32 0.0625, %v398_v33  ;;  %v404_v35 = vmul.f32 %v402_v32, %v402_v32 }
 0x418   :  { %v403_v36 = vsub.f32 %v392_v20, %v401_v34  ;;  %v406_v37 = vsel %vm182_vm5, %v404_v35, 0.0 }
 0x419   :  { %407 = vadd.xlane.f32.xlu1 %v406_v37 }
 0x41a   :  { %v405_v39 = vmul.f32 %v403_v36, %v403_v36 }
 0x41c   :  { %v409_v40 = vsel %vm182_vm5, %v405_v39, 0.0 }
 0x41d   :  { %410 = vadd.xlane.f32.xlu1 %v409_v40 }
 0x4a6   :  { %v408_v44 = vpop.xlane.xlu1 %407 }
 0x4a7   :  { %v412_v45 = vmul.f32 0.0625, %v408_v44 }
 0x4a9   :  { %v414_v46 = vadd.f32 1e-05, %v412_v45 }
 0x4aa   :  { %v411_v47 = vpop.xlane.xlu1 %410 }
 0x4ab   :  { %1314 = vrsqrt.f32 %v414_v46  ;;  %v413_v48 = vmul.f32 0.0625, %v411_v47  ;;  %v715_v46 = vld [vmem:[%s1672_s7 + $0x20] sm:$0xff]  ;;  %v716_v47 = vld [vmem:[%s1672_s7 + $0x28] sm:$0xff]  ;;  %s905_s7 = scalar_lea.vmem [#allocation2], %s904_s27  ;;  %s943_s27 = scalar_lea.vmem [#allocation2], %s1623_s16 }
 0x4ad   :  { %v415_v50 = vadd.f32 1e-05, %v413_v48  ;;  %v717_v48 = vpack.c.bf16 %v716_v47, %v715_v46 }
 0x4af   :  { %1316 = vrsqrt.f32 %v415_v50  ;;  %1272 = vmatpush3.bf16.msra.mxu1 %v717_v48 }
 0x4b0   :  { %1283 = vmatprep.subr.bf16.mxu1 %v1337_v2 }
 0x4b5   :  { %v1315_v52 = vpop.eup %1314 }
 0x4b6   :  { %v423_v53 = vmul.f32 %v1315_v52, %v1133_v51 }
 0x4b8   :  { %v425_v55 = vmul.f32 %v423_v53, %v402_v32 }
 0x4b9   :  { %v1317_v54 = vpop.eup %1316 }
 0x4ba   :  { %v424_v56 = vmul.f32 %v1317_v54, %v1133_v51  ;;  %v432_v59 = vadd.f32 %v1134_v57, %v425_v55 }
 0x4bc   :  { %v426_v58 = vmul.f32 %v424_v56, %v403_v36  ;;  %v1144_v56 = vld [vmem:[%s1669_s4 + $0x9] ss:$0 sm:$0xff] }
 0x4be   :  { %v433_v60 = vadd.f32 %v1134_v57, %v426_v58 }
 0x4c0   :  { %v434_v61 = vpack.c.bf16 %v433_v60, %v432_v59 }
 0x4c2   :  { %1244 = vmatmul.mubr.msk.bf16.vlgmr.msra.gmra.mrb[12].mxu0 %vm182_vm5, %v434_v61 }
 0x4c3   :  { %1254 = vmatpush3.bf16.msra.mxu0 %v434_v61  ;;  %1255 = vmatprep.mubr.msk.bf16.mxu0 %vm1338_vm1, %v1337_v2 }
 0x4c4   :  { %1265 = vmatprep.subr.bf16.mxu0 %v1337_v2 }
 0x4ca   :  { %1256 = vmatmul.mubr.msk.bf16.vlgmr.msra.gmra.mrb[16].mxu0 %vm182_vm5, %v1460_v49 }
 0x4cb   :  { %1267 = vmatprep.mubr.msk.bf16.mxu0 %vm1338_vm1, %v1337_v2  ;;  %1266 = vmatpush3.bf16.msra.mxu0 %v530_v1 }
 0x4cc   :  { %1277 = vmatprep.subr.bf16.mxu0 %v1337_v2 }
 0x595   :  { %v475_v3 = vpop.f32.mrb[12].mxu0 }
 0x596   :  { %v1542_v4 = vadd.f32 %v519_v21, %v475_v3  ;;  %v1245_v5 = vpop.f32.mrb[13].mxu0 }
 0x597   :  { %v478_v49 = vpop.f32.mrb[14].mxu0 }
 0x598   :  { %v1544_v6 = vadd.f32 %v522_v23, %v478_v49  ;;  %v1246_v8 = vpop.f32.mrb[15].mxu0 }
 0x59d   :  { %v566_v11 = vpop.f32.mrb[16].mxu0 }
 0x59e   :  { %v1257_v12 = vpop.f32.mrb[17].mxu0 }
 0x59f   :  { %v569_v13 = vpop.f32.mrb[18].mxu0 }
 0x5a0   :  { %v573_v14 = vpack.c.bf16 %v569_v13, %v566_v11  ;;  %v1258_v15 = vpop.f32.mrb[19].mxu0 }
 0x5a2   :  { %1268 = vmatmul.mubr.msk.bf16.vlgmr.msra.gmra.mrb[20].mxu0 %vm182_vm5, %v573_v14  ;;  %v1148_v14 = vld [vmem:[%s1669_s4 + $0xb] ss:$0 sm:$0xff] }
 0x5a3   :  { %1278 = vmatpush3.bf16.msra.mxu0 %v767_v16  ;;  %1279 = vmatprep.mubr.msk.bf16.mxu0 %vm1338_vm1, %v1337_v2 }
 0x5a4   :  { %1295 = vmatprep.subr.bf16.mxu0 %v1337_v2 }
 0x5aa   :  { %1280 = vmatmul.mubr.msk.bf16.vlgmr.msra.gmra.mrb[24].mxu0 %vm58_vm4, %v1448_v38 }
 0x5ab   :  { %1297 = vmatprep.mubr.msk.bf16.mxu0 %vm1338_vm1, %v1337_v2 }
 0x675   :  { %v658_v18 = vpop.f32.mrb[20].mxu0 }
 0x676   :  { %v659_v20 = vadd.f32 %v658_v18, %v620_v17  ;;  %v1269_v21 = vpop.f32.mrb[21].mxu0 }
 0x677   :  { %v661_v22 = vpop.f32.mrb[22].mxu0 }
 0x678   :  { %v670_v23 = vadd.f32 %v1143_v19, %v659_v20  ;;  %v662_v24 = vadd.f32 %v661_v22, %v620_v17  ;;  %v1270_v25 = vpop.f32.mrb[23].mxu0 }
 0x67a   :  { %v671_v27 = vadd.f32 %v1143_v19, %v662_v24  ;;  %v672_v28 = vmax.f32 %v670_v23, 0.0 }
 0x67c   :  { %v674_v38 = vsel %vm182_vm5, %v672_v28, 0.0  ;;  %v673_v29 = vmax.f32 %v671_v27, 0.0 }
 0x67d   :  { %675 = vadd.xlane.f32.xlu0 %v674_v38  ;;  %v803_v30 = vpop.f32.mrb[24].mxu0 }
 0x67e   :  { %v1281_v31 = vpop.f32.mrb[25].mxu0  ;;  %v677_v26 = vsel %vm182_vm5, %v673_v29, 0.0  ;;  %v812_v11 = vrot.slane %v803_v30, %v1499_v7  ;;  %v993_v7 = vld [vmem:[%s1673_s8] sm:$0xff] }
 0x67f   :  { %678 = vadd.xlane.f32.xlu1 %v677_v26  ;;  %v806_v32 = vpop.f32.mrb[26].mxu0 }
 0x680   :  { %v1282_v33 = vpop.f32.mrb[27].mxu0 }
 0x70a   :  { %v676_v34 = vpop.xlane.xlu0 %675 }
 0x70b   :  { %v680_v35 = vmul.f32 0.0625, %v676_v34 }
 0x70c   :  { %v679_v36 = vpop.xlane.xlu1 %678 }
 0x70d   :  { %v682_v37 = vsub.f32 %v672_v28, %v680_v35  ;;  %v681_v39 = vmul.f32 0.0625, %v679_v36 }
 0x70f   :  { %v683_v40 = vsub.f32 %v673_v29, %v681_v39  ;;  %v684_v41 = vmul.f32 %v682_v37, %v682_v37 }
 0x711   :  { %v686_v42 = vsel %vm182_vm5, %v684_v41, 0.0  ;;  %v685_v44 = vmul.f32 %v683_v40, %v683_v40 }
 0x712   :  { %687 = vadd.xlane.f32.xlu0 %v686_v42 }
 0x713   :  { %v689_v45 = vsel %vm182_vm5, %v685_v44, 0.0 }
 0x714   :  { %690 = vadd.xlane.f32.xlu1 %v689_v45 }
 0x725   :  { %845 = vrot.lane.b32.xlu1 %v1517_v43, %s1339_s18  ;;  %v1145_v43 = vld [vmem:[%s1669_s4 + $0xa] ss:$0 sm:$0xff] }
 0x728   :  { %843 = vrot.lane.b32.xlu0 %v1480_v62, %s1339_s18 }
 0x729   :  { %847 = vrot.lane.b32.xlu1 %v717_v48, %s1339_s18 }
 0x72d   :  { %849 = vrot.lane.b32.xlu1 %v765_v10, %s1339_s18  ;;  %s1632_s18 = sld [smem:[#allocation4 + $0xf]] }
 0x733   :  { %s957_s10 = scalar_lea.vmem [#allocation2], %s1632_s18 }
 0x79f   :  { %v688_v50 = vpop.xlane.xlu0 %687 }
 0x7a0   :  { %v692_v51 = vmul.f32 0.0625, %v688_v50 }
 0x7a1   :  { %v691_v52 = vpop.xlane.xlu1 %690 }
 0x7a2   :  { %v694_v53 = vadd.f32 1e-05, %v692_v51  ;;  %v693_v54 = vmul.f32 0.0625, %v691_v52 }
 0x7a3   :  { %v844_v3 = vpop.permute.xlu0 %843 }
 0x7a4   :  { %1318 = vrsqrt.f32 %v694_v53  ;;  %v695_v55 = vadd.f32 1e-05, %v693_v54 }
 0x7a5   :  { %v846_v5 = vpop.permute.xlu1 %845 }
 0x7a6   :  { %1320 = vrsqrt.f32 %v695_v55 }
 0x7a9   :  { %v848_v49 = vpop.permute.xlu1 %847 }
 0x7ad   :  { %v850_v8 = vpop.permute.xlu1 %849 }
 0x7ae   :  { %v1319_v57 = vpop.eup %1318  ;;  %v859_v9 = vsel %vm62_vm2, %v850_v8, 0 }
 0x7af   :  { %v703_v58 = vmul.f32 %v1319_v57, %v1144_v56 }
 0x7b0   :  { %v1321_v59 = vpop.eup %1320 }
 0x7b1   :  { %v705_v62 = vmul.f32 %v703_v58, %v682_v37  ;;  %v704_v60 = vmul.f32 %v1321_v59, %v1144_v56 }
 0x7b3   :  { %v706_v61 = vmul.f32 %v704_v60, %v683_v40  ;;  %v712_v63 = vadd.f32 %v1145_v43, %v705_v62 }
 0x7b5   :  { %v713_v0 = vadd.f32 %v1145_v43, %v706_v61 }
 0x7b7   :  { %v714_v1 = vpack.c.bf16 %v713_v0, %v712_v63 }
 0x7b9   :  { %1274 = vmatmul.mubr.msk.bf16.vlgmr.msra.gmra.mrb[20].mxu1 %vm182_vm5, %v714_v1 }
 0x7ba   :  { %1284 = vmatpush3.bf16.msra.mxu1 %v844_v3  ;;  %1291 = vmatprep.mubr.msk.bf16.mxu1 %vm1338_vm1, %v1337_v2 }
 0x7bb   :  { %1285 = vmatprep.subr.bf16.mxu1 %v1337_v2 }
 0x7be   :  { %1286 = vmatpush3.bf16.msra.mxu1 %v846_v5 }
 0x7bf   :  { %1287 = vmatprep.subr.bf16.mxu1 %v1337_v2 }
 0x7c2   :  { %1288 = vmatpush3.bf16.msra.mxu1 %v848_v49 }
 0x7c3   :  { %1289 = vmatprep.subr.bf16.mxu1 %v1337_v2 }
 0x7c6   :  { %1290 = vmatpush3.bf16.msra.mxu1 %v859_v9 }
 0x88c   :  { %v755_v10 = vpop.f32.mrb[20].mxu1 }
 0x88d   :  { %v762_v12 = vadd.f32 %v755_v10, %v1542_v4  ;;  %v1275_v13 = vpop.f32.mrb[21].mxu1  ;;  %v994_v4 = vld [vmem:[%s1673_s8 + $0x8] sm:$0xff]  ;;  %s1613_s8 = sld [smem:[#allocation4 + $0x3]] }
 0x88e   :  { %v758_v15 = vpop.f32.mrb[22].mxu1  ;;  %v995_v25 = vpack.c.bf16 %v994_v4, %v993_v7 }
 0x88f   :  { %v813_v16 = vadd.f32 %v812_v11, %v762_v12  ;;  %v763_v17 = vadd.f32 %v758_v15, %v1544_v6  ;;  %v1276_v18 = vpop.f32.mrb[23].mxu1  ;;  %v1149_v6 = vld [vmem:[%s1669_s4 + $0xc] ss:$0 sm:$0xff]  ;;  %v1166_v12 = vld [vmem:[%s1669_s4 + $0xd] ss:$0 sm:$0xff] }
 0x890   :  { %1296 = vmatpush3.bf16.msra.mxu0 %v995_v25  ;;  %1053 = vrot.lane.b32.xlu0 %v995_v25, %s1340_s26  ;;  %s940_s26 = scalar_lea.vmem [#allocation2], %s1621_s15 }
 0x891   :  { %v820_v19 = vadd.f32 %v1148_v14, %v813_v16  ;;  %v814_v20 = vadd.f32 %v812_v11, %v763_v17  ;;  %1301 = vmatprep.subr.bf16.mxu0 %v1337_v2 }
 0x893   :  { %v821_v21 = vadd.f32 %v1148_v14, %v814_v20  ;;  %v822_v22 = vmax.f32 %v820_v19, 0.0  ;;  %s926_s23 = scalar_lea.vmem [#allocation2], %s1613_s8  ;;  %v1168_v20 = vld [vmem:[%s1669_s4 + $0xe] ss:$0 sm:$0xff] }
 0x895   :  { %v823_v23 = vmax.f32 %v821_v21, 0.0 }
 0x897   :  { %v833_v24 = vpack.c.bf16 %v823_v23, %v822_v22 }
 0x899   :  { %1292 = vmatmul.mubr.msk.bf16.vlgmr.msra.gmra.mrb[24].mxu1 %vm854_vm6, %v833_v24 }
 0x902   :  { %v1054_v11 = vpop.permute.xlu0 %1053 }
 0x96c   :  { %v895_v27 = vpop.f32.mrb[24].mxu1 }
 0x96d   :  { %v896_v28 = vadd.f32 %v1149_v6, %v895_v27  ;;  %v1293_v38 = vpop.f32.mrb[25].mxu1 }
 0x96e   :  { %v898_v29 = vpop.f32.mrb[26].mxu1 }
 0x96f   :  { %902 = vst.msk [vmem:[#allocation2] sm:$0xff] %vm182_vm5, %v896_v28  ;;  %v899_v30 = vadd.f32 %v1149_v6, %v898_v29  ;;  %v1294_v31 = vpop.f32.mrb[27].mxu1 }
 0x971   :  { %903 = vst.msk [vmem:[#allocation2 + $0x8] sm:$0xff] %vm182_vm5, %v899_v30 }
 0x978   :  { %v906_v26 = vld [vmem:[%s905_s7] sm:$0x1] }
 0x979   :  { %v909_v32 = vld [vmem:[%s908_s0] sm:$0x1] }
 0x97a   :  { %v913_v33 = vld [vmem:[%s912_s19] sm:$0x1]  ;;  %v910_v53 = vmul.f32 %v909_v32, %v906_v26 }
 0x97b   :  { %v916_v34 = vld [vmem:[%s915_s20] sm:$0x1] }
 0x97c   :  { %v920_v35 = vld [vmem:[%s919_s21] sm:$0x1]  ;;  %v917_v37 = vmul.f32 %v916_v34, %v913_v33 }
 0x97d   :  { %v923_v36 = vld [vmem:[%s922_s22] sm:$0x1] }
 0x97e   :  { %v924_v39 = vmul.f32 %v923_v36, %v920_v35  ;;  %v927_v40 = vld [vmem:[%s926_s23] sm:$0x1]  ;;  %v961_v56 = vrot.slane %v917_v37, 7 }
 0x97f   :  { %v930_v41 = vld [vmem:[%s929_s2] sm:$0x1] }
 0x980   :  { %v934_v42 = vld [vmem:[%s933_s24] sm:$0x1]  ;;  %v931_v44 = vmul.f32 %v930_v41, %v927_v40  ;;  %v964_v57 = vrot.slane %v924_v39, 6  ;;  %v982_v60 = vsel %vm981_vm7, %v910_v53, %v961_v56 }
 0x981   :  { %v937_v45 = vld [vmem:[%s936_s25] sm:$0x1] }
 0x982   :  { %v941_v46 = vld [vmem:[%s940_s26] sm:$0x1]  ;;  %v938_v48 = vmul.f32 %v937_v45, %v934_v42  ;;  %v967_v62 = vrot.slane %v931_v44, 5  ;;  %v983_v61 = vsel %vm129_vm0, %v982_v60, %v964_v57 }
 0x983   :  { %v944_v47 = vld [vmem:[%s943_s27] sm:$0x1] }
 0x984   :  { %v948_v50 = vld [vmem:[%s947_s28] sm:$0x1]  ;;  %v945_v54 = vmul.f32 %v944_v47, %v941_v46  ;;  %v970_v43 = vrot.slane %v938_v48, 4  ;;  %v985_v0 = vsel %vm984_vm8, %v983_v61, %v967_v62 }
 0x985   :  { %v951_v51 = vld [vmem:[%s950_s29] sm:$0x1] }
 0x986   :  { %v955_v52 = vld [vmem:[%s954_s30] sm:$0x1]  ;;  %v952_v58 = vmul.f32 %v951_v51, %v948_v50  ;;  %v973_v63 = vrot.slane %v945_v54, 3  ;;  %v986_v3 = vsel %vm62_vm2, %v985_v0, %v970_v43 }
 0x987   :  { %v958_v55 = vld [vmem:[%s957_s10] sm:$0x1] }
 0x988   :  { %v959_v59 = vmul.f32 %v958_v55, %v955_v52  ;;  %v976_v1 = vrot.slane %v952_v58, 2  ;;  %v988_v49 = vsel %vm987_vm9, %v986_v3, %v973_v63 }
 0x98a   :  { %v979_v5 = vrot.slane %v959_v59, 1  ;;  %v990_v8 = vsel %vm989_vm10, %v988_v49, %v976_v1 }
 0x98c   :  { %v992_v9 = vsel %vm991_vm11, %v990_v8, %v979_v5 }
 0x98d   :  { %v996_v10 = vpack.c.bf16 %v992_v9, %v992_v9 }
 0x98f   :  { %1298 = vmatmul.mubr.msk.bf16.vlgmr.msra.gmra.mrb[28].mxu0 %vm182_vm5, %v996_v10 }
 0x990   :  { %1303 = vmatprep.mubr.msk.bf16.mxu0 %vm1338_vm1, %v1337_v2  ;;  %1302 = vmatpush3.bf16.msra.mxu0 %v1054_v11 }
 0xa62   :  { %v1039_v13 = vpop.f32.mrb[28].mxu0 }
 0xa63   :  { %v1040_v14 = vadd.f32 %v1166_v12, %v1039_v13  ;;  %v1299_v15 = vpop.f32.mrb[29].mxu0 }
 0xa64   :  { %v1042_v16 = vpop.f32.mrb[30].mxu0 }
 0xa65   :  { %v1045_v17 = vmax.f32 %v1040_v14, 0.0  ;;  %v1300_v18 = vpop.f32.mrb[31].mxu0 }
 0xa67   :  { %v1046_v19 = vpack.c.bf16 %v1045_v17, %v1045_v17 }
 0xa69   :  { %1304 = vmatmul.mubr.msk.bf16.vlgmr.msra.gmra.mrb[32].mxu0 %vm182_vm5, %v1046_v19 }
 0xb3c   :  { %v1093_v2 = vpop.f32.mrb[32].mxu0 }
 0xb3d   :  { %v1094_v21 = vadd.f32 %v1168_v20, %v1093_v2  ;;  %v1305_v22 = vpop.f32.mrb[33].mxu0 }
 0xb3e   :  { %v1096_v23 = vpop.f32.mrb[34].mxu0 }
 0xb3f   :  { %1100 = vst.msk [vmem:[%s1674_s9] sm:$0xff] %vm1099_vm12, %v1094_v21  ;;  %v1306_v24 = vpop.f32.mrb[35].mxu0 }
 0xb40   :  { %1105 = vsyncpa [#allocation5], 1 }

</bundles_post_ra>
